<compile_context>
chip_gen: v7x
topology: tpu7x:2x2x1
jax: 0.10.0
libtpu: 0.0.40
codegen_flags: <defaults>
</compile_context>

<pallas_src>
import jax
import jax.numpy as jnp
from jax.experimental import pallas as pl
from jax.experimental.pallas import tpu as pltpu


def _gelu(x):
    # act == nn.GELU(approximate='tanh').
    # TODO(synk): if the model config passes nn.GELU() (exact erf form) switch
    # to approximate=False; `act` is a constructor argument of the module.
    return jax.nn.gelu(x, approximate=True)


def _mlp_kernel(x_ref, w1_ref, b1_ref, w2_ref, b2_ref, w3_ref, b3_ref,
                o_ref, halo_ref):
    B, L, C = x_ref.shape
    H = w1_ref.shape[1]
    BL = B * L
    bf16 = jnp.bfloat16

    # Halo scratch: rows 0 and L+1 of every batch stay zero for the whole
    # kernel (== Conv1d zero padding); rows 1..L are overwritten per layer.
    halo_ref[...] = jnp.zeros_like(halo_ref)

    # ---- Conv1d(kernel_size=1): pointwise channel matmul over all B*L rows.
    x2d = x_ref[...].reshape(BL, C).astype(bf16)
    h = jnp.dot(x2d, w1_ref[...], preferred_element_type=jnp.float32)
    h = _gelu(h + b1_ref[...])                                   # (BL, H) f32

    def conv3(act, w_ref, b_ref):
        # Conv1d(kernel_size=3, padding=1) over the sequence axis with the
        # three taps fused into a single (BL, 3H) @ (3H, out) MXU matmul.
        halo_ref[:, 1:L + 1, :] = act.reshape(B, L, H)
        prev = halo_ref[:, 0:L, :].reshape(BL, H).astype(bf16)       # act[t-1]
        nxt = halo_ref[:, 2:L + 2, :].reshape(BL, H).astype(bf16)    # act[t+1]
        cat = jnp.concatenate([prev, act.astype(bf16), nxt], axis=-1)
        return jnp.dot(cat, w_ref[...],
                       preferred_element_type=jnp.float32) + b_ref[...]

    h2 = _gelu(conv3(h, w2_ref, b2_ref))                         # (BL, H) f32
    y = conv3(h2, w3_ref, b3_ref)                                # (BL, C) f32

    # nn.Dropout(p=resid_pdrop) is identity at inference.
    o_ref[...] = y.reshape(B, L, C).astype(o_ref.dtype)


def transformer_mlp(x_blc, w1, b1, w2, b2, w3, b3):
    """Transformer_MLP forward, channels-last.

    x_blc : (B, L, n_embd)  -- PyTorch's Conv1d layout (B, n_embd, L) maps here
            with a single transpose outside; keeping activations channels-last
            removes two HBM relayouts per call.
    w1    : (n_embd, H)     == conv1.weight[:, :, 0].T
    w2    : (3, H, H)       == conv2.weight permuted to (tap, in, out)
    w3    : (3, H, n_embd)  == conv3.weight permuted to (tap, in, out)
    b*    : (1, out_channels)
    """
    B, L, C = x_blc.shape
    H = w1.shape[1]

    # Fuse the three conv taps: (3, in, out) -> (3*in, out), matching the
    # [prev | center | next] channel concatenation built inside the kernel.
    w2f = w2.reshape(3 * H, H)
    w3f = w3.reshape(3 * H, C)

    # Weights ride the MXU in bf16 (f32 accumulation); biases stay f32.
    w1b = w1.astype(jnp.bfloat16)
    w2b = w2f.astype(jnp.bfloat16)
    w3b = w3f.astype(jnp.bfloat16)

    # Single grid step: at these sizes everything fits in VMEM and per-step
    # overhead dominates.
    # TODO(synk): for large B or L, reintroduce a parallel batch/sequence grid
    # axis (dimension_semantics=("parallel",)) so v7x's two TensorCores share
    # the work, and re-derive L tiling against its 64 MiB VMEM.
    return pl.pallas_call(
        _mlp_kernel,
        out_shape=jax.ShapeDtypeStruct((B, L, C), x_blc.dtype),
        grid_spec=pltpu.PrefetchScalarGridSpec(
            num_scalar_prefetch=0,
            grid=(1,),
            in_specs=[
                pl.BlockSpec((B, L, C), lambda i: (0, 0, 0)),      # x
                pl.BlockSpec((C, H), lambda i: (0, 0)),            # w1
                pl.BlockSpec((1, H), lambda i: (0, 0)),            # b1
                pl.BlockSpec((3 * H, H), lambda i: (0, 0)),        # w2 (fused taps)
                pl.BlockSpec((1, H), lambda i: (0, 0)),            # b2
                pl.BlockSpec((3 * H, C), lambda i: (0, 0)),        # w3 (fused taps)
                pl.BlockSpec((1, C), lambda i: (0, 0)),            # b3
            ],
            out_specs=pl.BlockSpec((B, L, C), lambda i: (0, 0, 0)),
            scratch_shapes=[pltpu.VMEM((B, L + 2, H), jnp.float32)],
        ),
        compiler_params=pltpu.CompilerParams(
            dimension_semantics=("arbitrary",)),
    )(x_blc, w1b, b1, w2b, b2, w3b, b3)


def transformer_mlp_pytorch_layout(x_ncl, *params):
    """Compatibility shim for PyTorch's (B, n_embd, L) Conv1d layout."""
    y = transformer_mlp(jnp.transpose(x_ncl, (0, 2, 1)), *params)
    return jnp.transpose(y, (0, 2, 1))


def _reference(x_blc, w1, b1, w2, b2, w3, b3):
    """Pure-JAX reference with identical semantics and precision choices
    (bf16 matmul inputs, f32 accumulation, zero-padded k=3 convs)."""
    bf16 = jnp.bfloat16

    def mm(a, w):
        return jnp.dot(a.astype(bf16), w.astype(bf16),
                       preferred_element_type=jnp.float32)

    def conv3(h, w, b):
        hp = jnp.pad(h, ((0, 0), (1, 1), (0, 0)))
        return (mm(hp[:, :-2], w[0]) + mm(hp[:, 1:-1], w[1])
                + mm(hp[:, 2:], w[2]) + b)

    h = _gelu(mm(x_blc, w1) + b1)
    h2 = _gelu(conv3(h, w2, b2))
    return conv3(h2, w3, b3)


if __name__ == "__main__":
    # Module hyperparameters
    n_embd = 32
    mlp_hidden_times = 4
    H = int(mlp_hidden_times * n_embd)   # 128
    B, L = 2, 16
    # resid_pdrop dropout -> identity at inference (not applied)

    key = jax.random.PRNGKey(0)
    ks = jax.random.split(key, 7)
    scale = 0.05

    # Channels-last activations (B, L, C). PyTorch (B, C, L) maps via a single
    # transpose (see transformer_mlp_pytorch_layout).
    x = jax.random.normal(ks[0], (B, L, n_embd), dtype=jnp.float32)

    # Parameters stored in kernel layout:
    #   w1: (C_in, H)      == conv1.weight[:, :, 0].T
    #   w2: (3, H, H)      == conv2.weight permuted to (tap, in, out)
    #   w3: (3, H, C_in)   == conv3.weight permuted to (tap, in, out)
    w1 = scale * jax.random.normal(ks[1], (n_embd, H), dtype=jnp.float32)
    b1 = scale * jax.random.normal(ks[2], (1, H), dtype=jnp.float32)
    w2 = scale * jax.random.normal(ks[3], (3, H, H), dtype=jnp.float32)
    b2 = scale * jax.random.normal(ks[4], (1, H), dtype=jnp.float32)
    w3 = scale * jax.random.normal(ks[5], (3, H, n_embd), dtype=jnp.float32)
    b3 = scale * jax.random.normal(ks[6], (1, n_embd), dtype=jnp.float32)

    out = jax.block_until_ready(transformer_mlp(x, w1, b1, w2, b2, w3, b3))
    ref = jax.block_until_ready(_reference(x, w1, b1, w2, b2, w3, b3))

    assert out.shape == (B, L, n_embd), out.shape
    max_err = float(jnp.max(jnp.abs(out - ref)))
    assert jnp.allclose(out, ref, atol=1e-3, rtol=1e-3), max_err

    print("KERNEL_OK")
</pallas_src>

<mosaic_0001>
module attributes {stable_mosaic.version = 11 : i64} {
  func.func @_mlp_kernel(%arg0: i32, %arg1: memref<2x16x32xf32, #tpu.memory_space<vmem>>, %arg2: memref<32x128xbf16, #tpu.memory_space<vmem>>, %arg3: memref<1x128xf32, #tpu.memory_space<vmem>>, %arg4: memref<384x128xbf16, #tpu.memory_space<vmem>>, %arg5: memref<1x128xf32, #tpu.memory_space<vmem>>, %arg6: memref<384x32xbf16, #tpu.memory_space<vmem>>, %arg7: memref<1x32xf32, #tpu.memory_space<vmem>>, %arg8: memref<2x16x32xf32, #tpu.memory_space<vmem>>, %arg9: memref<2x18x128xf32, #tpu.memory_space<vmem>>) attributes {dimension_semantics = [#tpu.dimension_semantics<arbitrary>], iteration_bounds = array<i64: 1>, scalar_prefetch = 0 : i64, scratch_operands = 1 : i64, tpu.core_type = #tpu.core_type<tc>, window_params = [{pipeline_mode = #tpu.pipeline_mode<synchronous>, transform_indices = @transform_0, window_bounds = array<i64: 2, 16, 32>}, {pipeline_mode = #tpu.pipeline_mode<synchronous>, transform_indices = @transform_1, window_bounds = array<i64: 32, 128>}, {pipeline_mode = #tpu.pipeline_mode<synchronous>, transform_indices = @transform_2, window_bounds = array<i64: 1, 128>}, {pipeline_mode = #tpu.pipeline_mode<synchronous>, transform_indices = @transform_3, window_bounds = array<i64: 384, 128>}, {pipeline_mode = #tpu.pipeline_mode<synchronous>, transform_indices = @transform_4, window_bounds = array<i64: 1, 128>}, {pipeline_mode = #tpu.pipeline_mode<synchronous>, transform_indices = @transform_5, window_bounds = array<i64: 384, 32>}, {pipeline_mode = #tpu.pipeline_mode<synchronous>, transform_indices = @transform_6, window_bounds = array<i64: 1, 32>}, {pipeline_mode = #tpu.pipeline_mode<synchronous>, transform_indices = @transform_7, window_bounds = array<i64: 2, 16, 32>}]} {
    %cst = arith.constant 0.000000e+00 : f32
    %0 = vector.broadcast %cst : f32 to vector<2x18x128xf32>
    %c0 = arith.constant 0 : index
    %c0_0 = arith.constant 0 : index
    %c0_1 = arith.constant 0 : index
    %1 = vector.load %arg9[%c0, %c0_0, %c0_1] : memref<2x18x128xf32, #tpu.memory_space<vmem>>, vector<2x18x128xf32>
    tpu.vector_store %arg9[%c0, %c0_0, %c0_1], %0 {strides = array<i32>} : memref<2x18x128xf32, #tpu.memory_space<vmem>>, vector<2x18x128xf32>,
    %c0_2 = arith.constant 0 : index
    %c0_3 = arith.constant 0 : index
    %c0_4 = arith.constant 0 : index
    %2 = vector.load %arg1[%c0_2, %c0_3, %c0_4] : memref<2x16x32xf32, #tpu.memory_space<vmem>>, vector<2x16x32xf32>
    %3 = vector.shape_cast %2 : vector<2x16x32xf32> to vector<32x32xf32>
    %4 = arith.truncf %3 : vector<32x32xf32> to vector<32x32xbf16>
    %c0_5 = arith.constant 0 : index
    %c0_6 = arith.constant 0 : index
    %5 = vector.load %arg2[%c0_5, %c0_6] : memref<32x128xbf16, #tpu.memory_space<vmem>>, vector<32x128xbf16>
    %cst_7 = arith.constant dense<0.000000e+00> : vector<32x128xf32>
    %6 = tpu.matmul %4, %5, %cst_7 {dimension_numbers = #tpu.dot_dimension_numbers<[1], [0], [0], [1], [0, 0, 1, 1], [], []>} : vector<32x32xbf16>, vector<32x128xbf16>, vector<32x128xf32> -> vector<32x128xf32>
    %c0_8 = arith.constant 0 : index
    %c0_9 = arith.constant 0 : index
    %7 = vector.load %arg3[%c0_8, %c0_9] : memref<1x128xf32, #tpu.memory_space<vmem>>, vector<1x128xf32>
    %8 = vector.broadcast %7 : vector<1x128xf32> to vector<32x128xf32>
    %9 = arith.addf %6, %8 : vector<32x128xf32>
    %10 = arith.mulf %9, %9 : vector<32x128xf32>
    %11 = arith.mulf %9, %10 : vector<32x128xf32>
    %cst_10 = arith.constant 4.471500e-02 : f32
    %12 = vector.broadcast %cst_10 : f32 to vector<32x128xf32>
    %13 = arith.mulf %12, %11 : vector<32x128xf32>
    %14 = arith.addf %9, %13 : vector<32x128xf32>
    %cst_11 = arith.constant 0.797884583 : f32
    %15 = vector.broadcast %cst_11 : f32 to vector<32x128xf32>
    %16 = arith.mulf %15, %14 : vector<32x128xf32>
    %17 = math.tanh %16 : vector<32x128xf32>
    %cst_12 = arith.constant 1.000000e+00 : f32
    %18 = vector.broadcast %cst_12 : f32 to vector<32x128xf32>
    %19 = arith.addf %18, %17 : vector<32x128xf32>
    %cst_13 = arith.constant 5.000000e-01 : f32
    %20 = vector.broadcast %cst_13 : f32 to vector<32x128xf32>
    %21 = arith.mulf %20, %19 : vector<32x128xf32>
    %22 = arith.mulf %9, %21 : vector<32x128xf32>
    %23 = vector.shape_cast %22 : vector<32x128xf32> to vector<2x16x128xf32>
    %c0_14 = arith.constant 0 : index
    %c1 = arith.constant 1 : index
    %c0_15 = arith.constant 0 : index
    %24 = vector.load %arg9[%c0_14, %c1, %c0_15] : memref<2x18x128xf32, #tpu.memory_space<vmem>>, vector<2x16x128xf32>
    tpu.vector_store %arg9[%c0_14, %c1, %c0_15], %23 {strides = array<i32>} : memref<2x18x128xf32, #tpu.memory_space<vmem>>, vector<2x16x128xf32>,
    %c0_16 = arith.constant 0 : index
    %c0_17 = arith.constant 0 : index
    %c0_18 = arith.constant 0 : index
    %25 = vector.load %arg9[%c0_16, %c0_17, %c0_18] : memref<2x18x128xf32, #tpu.memory_space<vmem>>, vector<2x16x128xf32>
    %26 = vector.shape_cast %25 : vector<2x16x128xf32> to vector<32x128xf32>
    %27 = arith.truncf %26 : vector<32x128xf32> to vector<32x128xbf16>
    %c0_19 = arith.constant 0 : index
    %c2 = arith.constant 2 : index
    %c0_20 = arith.constant 0 : index
    %28 = vector.load %arg9[%c0_19, %c2, %c0_20] : memref<2x18x128xf32, #tpu.memory_space<vmem>>, vector<2x16x128xf32>
    %29 = vector.shape_cast %28 : vector<2x16x128xf32> to vector<32x128xf32>
    %30 = arith.truncf %29 : vector<32x128xf32> to vector<32x128xbf16>
    %31 = arith.truncf %22 : vector<32x128xf32> to vector<32x128xbf16>
    %32 = tpu.concatenate %27, %31, %30 in 1 : vector<32x128xbf16>, vector<32x128xbf16>, vector<32x128xbf16> -> vector<32x384xbf16>
    %c0_21 = arith.constant 0 : index
    %c0_22 = arith.constant 0 : index
    %33 = vector.load %arg4[%c0_21, %c0_22] : memref<384x128xbf16, #tpu.memory_space<vmem>>, vector<384x128xbf16>
    %cst_23 = arith.constant dense<0.000000e+00> : vector<32x128xf32>
    %34 = tpu.matmul %32, %33, %cst_23 {dimension_numbers = #tpu.dot_dimension_numbers<[1], [0], [0], [1], [0, 0, 1, 1], [], []>} : vector<32x384xbf16>, vector<384x128xbf16>, vector<32x128xf32> -> vector<32x128xf32>
    %c0_24 = arith.constant 0 : index
    %c0_25 = arith.constant 0 : index
    %35 = vector.load %arg5[%c0_24, %c0_25] : memref<1x128xf32, #tpu.memory_space<vmem>>, vector<1x128xf32>
    %36 = vector.broadcast %35 : vector<1x128xf32> to vector<32x128xf32>
    %37 = arith.addf %34, %36 : vector<32x128xf32>
    %38 = arith.mulf %37, %37 : vector<32x128xf32>
    %39 = arith.mulf %37, %38 : vector<32x128xf32>
    %cst_26 = arith.constant 4.471500e-02 : f32
    %40 = vector.broadcast %cst_26 : f32 to vector<32x128xf32>
    %41 = arith.mulf %40, %39 : vector<32x128xf32>
    %42 = arith.addf %37, %41 : vector<32x128xf32>
    %cst_27 = arith.constant 0.797884583 : f32
    %43 = vector.broadcast %cst_27 : f32 to vector<32x128xf32>
    %44 = arith.mulf %43, %42 : vector<32x128xf32>
    %45 = math.tanh %44 : vector<32x128xf32>
    %cst_28 = arith.constant 1.000000e+00 : f32
    %46 = vector.broadcast %cst_28 : f32 to vector<32x128xf32>
    %47 = arith.addf %46, %45 : vector<32x128xf32>
    %cst_29 = arith.constant 5.000000e-01 : f32
    %48 = vector.broadcast %cst_29 : f32 to vector<32x128xf32>
    %49 = arith.mulf %48, %47 : vector<32x128xf32>
    %50 = arith.mulf %37, %49 : vector<32x128xf32>
    %51 = vector.shape_cast %50 : vector<32x128xf32> to vector<2x16x128xf32>
    %c0_30 = arith.constant 0 : index
    %c1_31 = arith.constant 1 : index
    %c0_32 = arith.constant 0 : index
    %52 = vector.load %arg9[%c0_30, %c1_31, %c0_32] : memref<2x18x128xf32, #tpu.memory_space<vmem>>, vector<2x16x128xf32>
    tpu.vector_store %arg9[%c0_30, %c1_31, %c0_32], %51 {strides = array<i32>} : memref<2x18x128xf32, #tpu.memory_space<vmem>>, vector<2x16x128xf32>,
    %c0_33 = arith.constant 0 : index
    %c0_34 = arith.constant 0 : index
    %c0_35 = arith.constant 0 : index
    %53 = vector.load %arg9[%c0_33, %c0_34, %c0_35] : memref<2x18x128xf32, #tpu.memory_space<vmem>>, vector<2x16x128xf32>
    %54 = vector.shape_cast %53 : vector<2x16x128xf32> to vector<32x128xf32>
    %55 = arith.truncf %54 : vector<32x128xf32> to vector<32x128xbf16>
    %c0_36 = arith.constant 0 : index
    %c2_37 = arith.constant 2 : index
    %c0_38 = arith.constant 0 : index
    %56 = vector.load %arg9[%c0_36, %c2_37, %c0_38] : memref<2x18x128xf32, #tpu.memory_space<vmem>>, vector<2x16x128xf32>
    %57 = vector.shape_cast %56 : vector<2x16x128xf32> to vector<32x128xf32>
    %58 = arith.truncf %57 : vector<32x128xf32> to vector<32x128xbf16>
    %59 = arith.truncf %50 : vector<32x128xf32> to vector<32x128xbf16>
    %60 = tpu.concatenate %55, %59, %58 in 1 : vector<32x128xbf16>, vector<32x128xbf16>, vector<32x128xbf16> -> vector<32x384xbf16>
    %c0_39 = arith.constant 0 : index
    %c0_40 = arith.constant 0 : index
    %61 = vector.load %arg6[%c0_39, %c0_40] : memref<384x32xbf16, #tpu.memory_space<vmem>>, vector<384x32xbf16>
    %cst_41 = arith.constant dense<0.000000e+00> : vector<32x32xf32>
    %62 = tpu.matmul %60, %61, %cst_41 {dimension_numbers = #tpu.dot_dimension_numbers<[1], [0], [0], [1], [0, 0, 1, 1], [], []>} : vector<32x384xbf16>, vector<384x32xbf16>, vector<32x32xf32> -> vector<32x32xf32>
    %c0_42 = arith.constant 0 : index
    %c0_43 = arith.constant 0 : index
    %63 = vector.load %arg7[%c0_42, %c0_43] : memref<1x32xf32, #tpu.memory_space<vmem>>, vector<1x32xf32>
    %64 = vector.broadcast %63 : vector<1x32xf32> to vector<32x32xf32>
    %65 = arith.addf %62, %64 : vector<32x32xf32>
    %66 = vector.shape_cast %65 : vector<32x32xf32> to vector<2x16x32xf32>
    %c0_44 = arith.constant 0 : index
    %c0_45 = arith.constant 0 : index
    %c0_46 = arith.constant 0 : index
    %67 = vector.load %arg8[%c0_44, %c0_45, %c0_46] : memref<2x16x32xf32, #tpu.memory_space<vmem>>, vector<2x16x32xf32>
    tpu.vector_store %arg8[%c0_44, %c0_45, %c0_46], %66 {strides = array<i32>} : memref<2x16x32xf32, #tpu.memory_space<vmem>>, vector<2x16x32xf32>,
    return
  }
  func.func @transform_0(%arg0: i32) -> (i32, i32, i32) {
    %c0_i32 = arith.constant 0 : i32
    %c0_i32_0 = arith.constant 0 : i32
    %c0_i32_1 = arith.constant 0 : i32
    %c0_i32_2 = arith.constant 0 : i32
    return %c0_i32, %c0_i32_0, %c0_i32_1 : i32, i32, i32
  }
  func.func @transform_1(%arg0: i32) -> (i32, i32) {
    %c0_i32 = arith.constant 0 : i32
    %c0_i32_0 = arith.constant 0 : i32
    %c0_i32_1 = arith.constant 0 : i32
    return %c0_i32, %c0_i32_0 : i32, i32
  }
  func.func @transform_2(%arg0: i32) -> (i32, i32) {
    %c0_i32 = arith.constant 0 : i32
    %c0_i32_0 = arith.constant 0 : i32
    %c0_i32_1 = arith.constant 0 : i32
    return %c0_i32, %c0_i32_0 : i32, i32
  }
  func.func @transform_3(%arg0: i32) -> (i32, i32) {
    %c0_i32 = arith.constant 0 : i32
    %c0_i32_0 = arith.constant 0 : i32
    %c0_i32_1 = arith.constant 0 : i32
    return %c0_i32, %c0_i32_0 : i32, i32
  }
  func.func @transform_4(%arg0: i32) -> (i32, i32) {
    %c0_i32 = arith.constant 0 : i32
    %c0_i32_0 = arith.constant 0 : i32
    %c0_i32_1 = arith.constant 0 : i32
    return %c0_i32, %c0_i32_0 : i32, i32
  }
  func.func @transform_5(%arg0: i32) -> (i32, i32) {
    %c0_i32 = arith.constant 0 : i32
    %c0_i32_0 = arith.constant 0 : i32
    %c0_i32_1 = arith.constant 0 : i32
    return %c0_i32, %c0_i32_0 : i32, i32
  }
  func.func @transform_6(%arg0: i32) -> (i32, i32) {
    %c0_i32 = arith.constant 0 : i32
    %c0_i32_0 = arith.constant 0 : i32
    %c0_i32_1 = arith.constant 0 : i32
    return %c0_i32, %c0_i32_0 : i32, i32
  }
  func.func @transform_7(%arg0: i32) -> (i32, i32, i32) {
    %c0_i32 = arith.constant 0 : i32
    %c0_i32_0 = arith.constant 0 : i32
    %c0_i32_1 = arith.constant 0 : i32
    %c0_i32_2 = arith.constant 0 : i32
    return %c0_i32, %c0_i32_0, %c0_i32_1 : i32, i32, i32
  }
}

</mosaic_0001>

<bundles_post_ra>
// kernel: tpu_custom_call.1
= control target key start
LH: loop header
LB: loop body
LE: loop exit
PB: predicated region body
PF: predicated region fallthrough
CT: control target
= control target key end

     0   :  { %vm63_vm0 = vcmask 261120   ;;  %s1351_s0 = inlined_call_operand.vmem [shape: f32[2,16,32], index: 0, kind: input, shape index: {}]   ;;  %s1352_s1 = inlined_call_operand.vmem [shape: bf16[32,128], index: 1, kind: input, shape index: {}]   ;;  %s1353_s2 = inlined_call_operand.vmem [shape: f32[1,128], index: 2, kind: input, shape index: {}]   ;;  %s1354_s3 = inlined_call_operand.vmem [shape: bf16[384,128], index: 3, kind: input, shape index: {}]   ;;  %s1355_s4 = inlined_call_operand.vmem [shape: f32[1,128], index: 4, kind: input, shape index: {}]   ;;  %s1356_s5 = inlined_call_operand.vmem [shape: bf16[384,32], index: 5, kind: input, shape index: {}]   ;;  %s1357_s6 = inlined_call_operand.vmem [shape: f32[1,32], index: 6, kind: input, shape index: {}]   ;;  %s1358_s7 = inlined_call_operand.hbm [shape: f32[2,16,32], index: 7, kind: output, shape index: {}]  }
   0x1   :  { %v1028_v0 = vld [vmem:[%s1352_s1] sm:$0xff]   ;;  %v1029_v1 = vld [vmem:[%s1352_s1 + $0x8] sm:$0xff]   ;;  %v36_v4 = vld [vmem:[%s1351_s0 + $0x10] sm:$0xff] }
   0x2   :  { %976 = vmatprep.subr.bf16.mxu0 %v1028_v0  ;;  %v34_v2 = vld [vmem:[%s1351_s0] sm:$0xff]  ;;  %v35_v3 = vld [vmem:[%s1351_s0 + $0x8] sm:$0xff]  ;;  %v37_v6 = vld [vmem:[%s1351_s0 + $0x18] sm:$0xff] }
   0x3   :  { %977 = vmatpush3.bf16.msra.mxu0 %v1028_v0  ;;  %v38_v5 = vpack.c.bf16 %v35_v3, %v34_v2  ;;  %v39_v7 = vpack.c.bf16 %v37_v6, %v36_v4 }
   0x4   :  { %978 = vmatprep.subr.bf16.mxu0 %v1029_v1 }
   0x5   :  { %980 = vmatprep.mubr.msk.bf16.mxu0 %vm63_vm0, %v38_v5 }
   0x7   :  { %979 = vmatpush3.bf16.msra.mxu0 %v1029_v1 }
   0xa   :  { %981 = vmatmul.mubr.msk.bf16.vlgmr.msra.gmra.mrb[0].mxu0 %vm63_vm0, %v39_v7 }
   0xb   :  { %12 = vsyncpa [#allocation4], 0  ;;  %v1030_v8 = vld [vmem:[%s1354_s3 + $0x40] sm:$0xff]   ;;  %v1033_v11 = vld [vmem:[%s1354_s3 + $0x48] sm:$0xff]   ;;  %v1118_v17 = vmov 0.0   ;;  %s1119_s9 = smov [#allocation3]  }
   0xc   :  { %v1031_v9 = vld [vmem:[%s1354_s3] sm:$0xff]   ;;  %900 = vmatprep.subr.bf16.mxu1 %v1030_v8  ;;  %v1034_v12 = vld [vmem:[%s1354_s3 + $0x8] sm:$0xff]   ;;  %v1036_v14 = vld [vmem:[%s1354_s3 + $0x50] sm:$0xff]   ;;  %28 = vst [vmem:[#allocation2] sm:$0xff] %v1118_v17  ;;  %s830_s10 = sshll.u32 %s1119_s9, 4  ;;  %s831_s10 = int_to_ptr.vmem [resolvable:$true] %s830_s10 }
   0xd   :  { %v1032_v10 = vld [vmem:[%s1354_s3 + $0x80] sm:$0xff]   ;;  %901 = vmatpush3.bf16.msra.mxu1 %v1031_v9  ;;  %v1035_v13 = vld [vmem:[%s1354_s3 + $0x88] sm:$0xff]   ;;  %v1038_v15 = vld [vmem:[%s1354_s3 + $0x90] sm:$0xff]   ;;  %29 = vst [vmem:[#allocation2 + $0x8] sm:$0xff] %v1118_v17  ;;  %p1099_p1 = scmp.lt.s32.totalorder %s831_s10, %s831_s10 }
   0xe   :  { %984 = vmatprep.subr.bf16.mxu0 %v1032_v10  ;;  %902 = vmatprep.subr.bf16.mxu1 %v1033_v11  ;;  %v1037_v16 = vld [vmem:[%s1354_s3 + $0x10] sm:$0xff]   ;;  %30 = vst [vmem:[#allocation2 + $0x10] sm:$0x3] %v1118_v17  ;;  %31 = vst [vmem:[#allocation2 + $0x18] sm:$0xff] %v1118_v17  ;;  %v1039_v18 = vld [vmem:[%s1354_s3 + $0x58] sm:$0xff]  }
   0xf   :  { %985 = vmatpush3.bf16.msra.mxu0 %v1032_v10  ;;  %32 = vst [vmem:[#allocation2 + $0x20] sm:$0xff] %v1118_v17  ;;  %33 = vst [vmem:[#allocation2 + $0x28] sm:$0x3] %v1118_v17  ;;  %v1041_v19 = vld [vmem:[%s1354_s3 + $0x98] sm:$0xff]   ;;  %v1042_v21 = vld [vmem:[%s1354_s3 + $0x60] sm:$0xff]  }
  0x10   :  { %986 = vmatprep.subr.bf16.mxu0 %v1035_v13  ;;  %v1040_v20 = vld [vmem:[%s1354_s3 + $0x18] sm:$0xff]   ;;  %v1044_v22 = vld [vmem:[%s1354_s3 + $0xa0] sm:$0xff]   ;;  %v1045_v24 = vld [vmem:[%s1354_s3 + $0x68] sm:$0xff]  }
  0x11   :  { %903 = vmatpush3.bf16.msra.mxu1 %v1034_v12  ;;  %v1043_v23 = vld [vmem:[%s1354_s3 + $0x20] sm:$0xff]   ;;  %v1047_v25 = vld [vmem:[%s1354_s3 + $0xa8] sm:$0xff]   ;;  %v1048_v27 = vld [vmem:[%s1354_s3 + $0x70] sm:$0xff]  }
  0x12   :  { %904 = vmatprep.subr.bf16.mxu1 %v1036_v14  ;;  %v1046_v26 = vld [vmem:[%s1354_s3 + $0x28] sm:$0xff]   ;;  %v1049_v28 = vld [vmem:[%s1354_s3 + $0x30] sm:$0xff]   ;;  %v1051_v30 = vld [vmem:[%s1354_s3 + $0x78] sm:$0xff]  }
  0x13   :  { %987 = vmatpush3.bf16.msra.mxu0 %v1035_v13  ;;  %v1050_v29 = vld [vmem:[%s1354_s3 + $0xb0] sm:$0xff]   ;;  %v1053_v31 = vld [vmem:[%s1354_s3 + $0xb8] sm:$0xff]   ;;  %v841_v33 = vld [vmem:[%s1353_s2] ss:$0 sm:$0xff] }
  0x14   :  { %988 = vmatprep.subr.bf16.mxu0 %v1038_v15  ;;  %v1052_v32 = vld [vmem:[%s1354_s3 + $0x38] sm:$0xff]  }
  0x15   :  { %905 = vmatpush3.bf16.msra.mxu1 %v1037_v16 }
  0x16   :  { %906 = vmatprep.subr.bf16.mxu1 %v1039_v18 }
  0x17   :  { %989 = vmatpush3.bf16.msra.mxu0 %v1038_v15 }
  0x18   :  { %990 = vmatprep.subr.bf16.mxu0 %v1041_v19 }
  0x19   :  { %907 = vmatpush3.bf16.msra.mxu1 %v1040_v20 }
  0x1a   :  { %908 = vmatprep.subr.bf16.mxu1 %v1042_v21 }
  0x1b   :  { %991 = vmatpush3.bf16.msra.mxu0 %v1041_v19 }
  0x1c   :  { %992 = vmatprep.subr.bf16.mxu0 %v1044_v22 }
  0x1d   :  { %909 = vmatpush3.bf16.msra.mxu1 %v1043_v23 }
  0x1e   :  { %910 = vmatprep.subr.bf16.mxu1 %v1045_v24 }
  0x1f   :  { %993 = vmatpush3.bf16.msra.mxu0 %v1044_v22 }
  0x20   :  { %994 = vmatprep.subr.bf16.mxu0 %v1047_v25 }
  0x21   :  { %911 = vmatpush3.bf16.msra.mxu1 %v1046_v26 }
  0x22   :  { %912 = vmatprep.subr.bf16.mxu1 %v1048_v27 }
  0x23   :  { %995 = vmatpush3.bf16.msra.mxu0 %v1047_v25 }
  0x24   :  { %996 = vmatprep.subr.bf16.mxu0 %v1050_v29 }
  0x25   :  { %913 = vmatpush3.bf16.msra.mxu1 %v1049_v28  ;;  %v1054_v28 = vld [vmem:[%s1356_s5 + $0x40] sm:$0xff]  }
  0x26   :  { %914 = vmatprep.subr.bf16.mxu1 %v1051_v30  ;;  %v1056_v30 = vld [vmem:[%s1356_s5 + $0x48] sm:$0xff]  }
  0x27   :  { %997 = vmatpush3.bf16.msra.mxu0 %v1050_v29  ;;  %v1055_v29 = vld [vmem:[%s1356_s5] sm:$0xff]  }
  0x28   :  { %998 = vmatprep.subr.bf16.mxu0 %v1053_v31 }
  0x29   :  { %915 = vmatpush3.bf16.msra.mxu1 %v1052_v32  ;;  %v1058_v32 = vld [vmem:[%s1356_s5 + $0x50] sm:$0xff]  }
  0x2a   :  { %938 = vmatprep.subr.bf16.mxu1 %v1054_v28 }
  0x2b   :  { %999 = vmatpush3.bf16.msra.mxu0 %v1053_v31  ;;  %v1057_v31 = vld [vmem:[%s1356_s5 + $0x8] sm:$0xff]  }
  0xdd   :  { %v982_v34 = vpop.f32.mrb[0].mxu0 }
  0xde   :  { %v113_v35 = vadd.f32 %v982_v34, %v841_v33  ;;  %v104_v36 = vpop.f32.mrb[1].mxu0  ;;  %v1060_v34 = vld [vmem:[%s1356_s5 + $0x10] sm:$0xff]  }
  0xdf   :  { %v105_v37 = vadd.f32 %v841_v33, %v104_v36  ;;  %v983_v38 = vpop.f32.mrb[2].mxu0  ;;  %v1062_v36 = vld [vmem:[%s1356_s5 + $0x88] sm:$0xff]  }
  0xe0   :  { %v121_v39 = vmul.f32 %v113_v35, %v113_v35  ;;  %v116_v40 = vadd.f32 %v983_v38, %v841_v33  ;;  %v107_v41 = vpop.f32.mrb[3].mxu0  ;;  %v1064_v38 = vld [vmem:[%s1356_s5 + $0x60] sm:$0xff]  }
  0xe1   :  { %v119_v42 = vmul.f32 %v105_v37, %v105_v37  ;;  %v108_v43 = vadd.f32 %v841_v33, %v107_v41  ;;  %v1059_v33 = vld [vmem:[%s1356_s5 + $0x80] sm:$0xff]   ;;  %v1067_v41 = vld [vmem:[%s1356_s5 + $0x68] sm:$0xff]  }
  0xe2   :  { %v125_v44 = vmul.f32 %v121_v39, %v113_v35  ;;  %v122_v45 = vmul.f32 %v116_v40, %v116_v40  ;;  %1004 = vmatprep.subr.bf16.mxu0 %v1059_v33  ;;  %v1065_v39 = vld [vmem:[%s1356_s5 + $0x90] sm:$0xff]  }
  0xe3   :  { %v123_v46 = vmul.f32 %v119_v42, %v105_v37  ;;  %v120_v47 = vmul.f32 %v108_v43, %v108_v43  ;;  %v1068_v42 = vld [vmem:[%s1356_s5 + $0x98] sm:$0xff]  }
  0xe4   :  { %v129_v48 = vmul.f32 0.044715, %v125_v44  ;;  %v126_v49 = vmul.f32 %v122_v45, %v116_v40  ;;  %v1070_v44 = vld [vmem:[%s1356_s5 + $0x70] sm:$0xff]   ;;  %v1071_v45 = vld [vmem:[%s1356_s5 + $0xa0] sm:$0xff]  }
  0xe5   :  { %v127_v50 = vmul.f32 0.044715, %v123_v46  ;;  %v124_v51 = vmul.f32 %v120_v47, %v108_v43  ;;  %v1072_v46 = vld [vmem:[%s1356_s5 + $0x30] sm:$0xff]   ;;  %v1073_v47 = vld [vmem:[%s1356_s5 + $0x78] sm:$0xff]  }
  0xe6   :  { %v133_v52 = vadd.f32 %v129_v48, %v113_v35  ;;  %v130_v53 = vmul.f32 0.044715, %v126_v49  ;;  %v1074_v48 = vld [vmem:[%s1356_s5 + $0xa8] sm:$0xff]   ;;  %v1075_v49 = vld [vmem:[%s1356_s5 + $0x38] sm:$0xff]  }
  0xe7   :  { %v128_v54 = vmul.f32 0.044715, %v124_v51  ;;  %v131_v55 = vadd.f32 %v127_v50, %v105_v37  ;;  %v1076_v50 = vld [vmem:[%s1356_s5 + $0xb0] sm:$0xff]   ;;  %v1077_v51 = vld [vmem:[%s1356_s5 + $0xb8] sm:$0xff]  }
  0xe8   :  { %v137_v56 = vmul.f32 0.7978846, %v133_v52  ;;  %v134_v57 = vadd.f32 %v130_v53, %v116_v40 }
  0xe9   :  { %v132_v58 = vadd.f32 %v128_v54, %v108_v43  ;;  %v135_v59 = vmul.f32 0.7978846, %v131_v55  ;;  %v846_v55 = vld [vmem:[%s1355_s4] ss:$0 sm:$0xff] }
  0xea   :  { %1078 = vtanh.f32 %v137_v56  ;;  %v138_v60 = vmul.f32 0.7978846, %v134_v57 }
  0xeb   :  { %v136_v61 = vmul.f32 0.7978846, %v132_v58  ;;  %1080 = vtanh.f32 %v135_v59 }
  0xec   :  { %1082 = vtanh.f32 %v138_v60 }
  0xed   :  { %1084 = vtanh.f32 %v136_v61 }
  0xf4   :  { %v1079_v62 = vpop.eup %1078 }
  0xf5   :  { %v1081_v63 = vpop.eup %1080  ;;  %v145_v0 = vadd.f32 1.0, %v1079_v62 }
  0xf6   :  { %v1083_v1 = vpop.eup %1082  ;;  %v143_v2 = vadd.f32 1.0, %v1081_v63 }
  0xf7   :  { %v1085_v3 = vpop.eup %1084  ;;  %v146_v4 = vadd.f32 1.0, %v1083_v1  ;;  %v149_v5 = vmul.f32 0.5, %v145_v0 }
  0xf8   :  { %v144_v6 = vadd.f32 1.0, %v1085_v3  ;;  %v147_v7 = vmul.f32 0.5, %v143_v2 }
  0xf9   :  { %v150_v8 = vmul.f32 0.5, %v146_v4  ;;  %v153_v9 = vmul.f32 %v149_v5, %v113_v35  ;;  %v1061_v35 = vld [vmem:[%s1356_s5 + $0x58] sm:$0xff]  }
  0xfa   :  { %v148_v10 = vmul.f32 0.5, %v144_v6  ;;  %v151_v11 = vmul.f32 %v147_v7, %v105_v37  ;;  %v1063_v37 = vld [vmem:[%s1356_s5 + $0x18] sm:$0xff]  }
  0xfb   :  { %v154_v12 = vmul.f32 %v150_v8, %v116_v40  ;;  %157 = vst [vmem:[#allocation2 + $0x19] sm:$0xff] %v153_v9  ;;  %v1066_v40 = vld [vmem:[%s1356_s5 + $0x20] sm:$0xff]  }
  0xfc   :  { %v152_v13 = vmul.f32 %v148_v10, %v108_v43  ;;  %155 = vst [vmem:[#allocation2 + $0x1] sm:$0xff] %v151_v11  ;;  %v1069_v43 = vld [vmem:[%s1356_s5 + $0x28] sm:$0xff]  }
  0xfd   :  { %158 = vst [vmem:[#allocation2 + $0x21] sm:$0xff] %v154_v12  ;;  %v172_v14 = vpack.c.bf16 %v154_v12, %v153_v9 }
  0xfe   :  { %156 = vst [vmem:[#allocation2 + $0x9] sm:$0xff] %v152_v13  ;;  %v171_v15 = vpack.c.bf16 %v152_v13, %v151_v11 }
 0x100   :  { %404 = vmatprep.mubr.bf16.mxu1 %v171_v15 }
 0x102   :  { %v161_v26 = vld [vmem:[#allocation2 + $0x18] sm:$0xff] }
 0x103   :  { %v159_v16 = vld [vmem:[#allocation2] sm:$0xff] }
 0x104   :  { %v167_v17 = vld [vmem:[#allocation2 + $0x1a] sm:$0xff]  ;;  %v168_v18 = vld [vmem:[#allocation2 + $0x22] sm:$0xff] }
 0x105   :  { %v160_v19 = vld [vmem:[#allocation2 + $0x8] sm:$0xff]  ;;  %v170_v24 = vpack.c.bf16 %v168_v18, %v167_v17  ;;  %v162_v25 = vld [vmem:[#allocation2 + $0x20] sm:$0xff] }
 0x106   :  { %v165_v20 = vld [vmem:[#allocation2 + $0x2] sm:$0xff]  ;;  %v166_v21 = vld [vmem:[#allocation2 + $0xa] sm:$0xff]  ;;  %v163_v22 = vpack.c.bf16 %v160_v19, %v159_v16  ;;  %v164_v27 = vpack.c.bf16 %v162_v25, %v161_v26 }
 0x107   :  { %v169_v23 = vpack.c.bf16 %v166_v21, %v165_v20 }
 0x108   :  { %405 = vmatmul.mubr.bf16.vlgmr.msra.gmra.mrb[0].mxu1 %v163_v22 }
 0x109   :  { %1000 = vmatprep.mubr.bf16.mxu0 %v169_v23  ;;  %412 = vmatprep.mubr.bf16.mxu1 %v172_v14 }
 0x10a   :  { %1001 = vmatmul.mubr.bf16.vlgmr.msra.gmra.mrb[4].mxu0 %v170_v24  ;;  %939 = vmatpush3.bf16.msra.mxu1 %v1055_v29 }
 0x10b   :  { %940 = vmatprep.subr.bf16.mxu1 %v1056_v30  ;;  %1005 = vmatpush3.bf16.msra.mxu0 %v1059_v33 }
 0x10c   :  { %1006 = vmatprep.subr.bf16.mxu0 %v1062_v36 }
 0x10e   :  { %941 = vmatpush3.bf16.msra.mxu1 %v1057_v31 }
 0x10f   :  { %942 = vmatprep.subr.bf16.mxu1 %v1058_v32  ;;  %1007 = vmatpush3.bf16.msra.mxu0 %v1062_v36 }
 0x110   :  { %413 = vmatmul.mubr.bf16.gmra.mrb[4].mxu1 %v164_v27  ;;  %1008 = vmatprep.subr.bf16.mxu0 %v1065_v39 }
 0x112   :  { %943 = vmatpush3.bf16.msra.mxu1 %v1060_v34 }
 0x113   :  { %944 = vmatprep.subr.bf16.mxu1 %v1061_v35  ;;  %1009 = vmatpush3.bf16.msra.mxu0 %v1065_v39 }
 0x114   :  { %1010 = vmatprep.subr.bf16.mxu0 %v1068_v42 }
 0x116   :  { %945 = vmatpush3.bf16.msra.mxu1 %v1063_v37 }
 0x117   :  { %946 = vmatprep.subr.bf16.mxu1 %v1064_v38  ;;  %1011 = vmatpush3.bf16.msra.mxu0 %v1068_v42 }
 0x118   :  { %1012 = vmatprep.subr.bf16.mxu0 %v1071_v45 }
 0x11a   :  { %947 = vmatpush3.bf16.msra.mxu1 %v1066_v40 }
 0x11b   :  { %948 = vmatprep.subr.bf16.mxu1 %v1067_v41  ;;  %1013 = vmatpush3.bf16.msra.mxu0 %v1071_v45 }
 0x11c   :  { %1014 = vmatprep.subr.bf16.mxu0 %v1074_v48 }
 0x11e   :  { %949 = vmatpush3.bf16.msra.mxu1 %v1069_v43 }
 0x11f   :  { %950 = vmatprep.subr.bf16.mxu1 %v1070_v44  ;;  %1015 = vmatpush3.bf16.msra.mxu0 %v1074_v48 }
 0x120   :  { %1016 = vmatprep.subr.bf16.mxu0 %v1076_v50 }
 0x122   :  { %951 = vmatpush3.bf16.msra.mxu1 %v1072_v46 }
 0x123   :  { %952 = vmatprep.subr.bf16.mxu1 %v1073_v47  ;;  %1017 = vmatpush3.bf16.msra.mxu0 %v1076_v50 }
 0x124   :  { %1018 = vmatprep.subr.bf16.mxu0 %v1077_v51 }
 0x126   :  { %953 = vmatpush3.bf16.msra.mxu1 %v1075_v49 }
 0x127   :  { %1019 = vmatpush3.bf16.msra.mxu0 %v1077_v51 }
 0x1db   :  { %v916_v52 = vpop.f32.mrb[0].mxu1 }
 0x1dc   :  { %v917_v53 = vpop.f32.mrb[1].mxu1 }
 0x1dd   :  { %v1002_v54 = vpop.f32.mrb[4].mxu0  ;;  %v918_v56 = vadd.f32 %v917_v53, %v916_v52  ;;  %v919_v57 = vpop.f32.mrb[2].mxu1 }
 0x1de   :  { %v455_v58 = vpop.f32.mrb[5].mxu0  ;;  %v920_v59 = vpop.f32.mrb[3].mxu1 }
 0x1df   :  { %v1003_v60 = vpop.f32.mrb[6].mxu0  ;;  %v407_v61 = vadd.f32 %v918_v56, %v846_v55  ;;  %v921_v62 = vadd.f32 %v920_v59, %v919_v57 }
 0x1e0   :  { %v458_v63 = vpop.f32.mrb[7].mxu0 }
 0x1e1   :  { %v456_v0 = vadd.f32 %v455_v58, %v407_v61  ;;  %v410_v1 = vadd.f32 %v921_v62, %v846_v55 }
 0x1e3   :  { %v470_v2 = vmul.f32 %v456_v0, %v456_v0  ;;  %v459_v3 = vadd.f32 %v458_v63, %v410_v1  ;;  %v922_v4 = vpop.f32.mrb[4].mxu1 }
 0x1e4   :  { %v923_v5 = vpop.f32.mrb[5].mxu1 }
 0x1e5   :  { %v474_v6 = vmul.f32 %v470_v2, %v456_v0  ;;  %v471_v7 = vmul.f32 %v459_v3, %v459_v3  ;;  %v924_v8 = vadd.f32 %v923_v5, %v922_v4  ;;  %v925_v9 = vpop.f32.mrb[6].mxu1  ;;  %v871_v5 = vld [vmem:[%s1357_s6] ss:$0 sm:$0xff]  ;;  %s1094_s6 = scalar_lea.vmem %s831_s10, 512 }
 0x1e6   :  { %v926_v10 = vpop.f32.mrb[7].mxu1  ;;  %p1095_p0 = scmp.ne.s32.totalorder %s831_s10, %s1094_s6  ;;  %p1100_p2 = scmp.lt.s32.totalorder %s1094_s6, %s1094_s6 }
 0x1e7   :  { %v478_v11 = vmul.f32 0.044715, %v474_v6  ;;  %v475_v12 = vmul.f32 %v471_v7, %v459_v3  ;;  %v415_v13 = vadd.f32 %v924_v8, %v846_v55  ;;  %v927_v14 = vadd.f32 %v926_v10, %v925_v9 }
 0x1e8   :  { %p1101_p3 = por %p1100_p2, %p1099_p1 }
 0x1e9   :  { %v482_v15 = vadd.f32 %v478_v11, %v456_v0  ;;  %v479_v16 = vmul.f32 0.044715, %v475_v12  ;;  %v464_v17 = vadd.f32 %v1002_v54, %v415_v13  ;;  %v418_v18 = vadd.f32 %v927_v14, %v846_v55 }
 0x1ea   :  { %p1102_p4 = pnand %p1101_p3, %p1095_p0 }
 0x1eb   :  { %v486_v19 = vmul.f32 0.7978846, %v482_v15  ;;  %v483_v20 = vadd.f32 %v479_v16, %v459_v3  ;;  %v472_v21 = vmul.f32 %v464_v17, %v464_v17  ;;  %v467_v22 = vadd.f32 %v1003_v60, %v418_v18 }
 0x1ed   :  { %1086 = vtanh.f32 %v486_v19  ;;  %v487_v23 = vmul.f32 0.7978846, %v483_v20  ;;  %v476_v24 = vmul.f32 %v472_v21, %v464_v17  ;;  %v473_v25 = vmul.f32 %v467_v22, %v467_v22 }
 0x1ef   :  { %1088 = vtanh.f32 %v487_v23  ;;  %v480_v26 = vmul.f32 0.044715, %v476_v24  ;;  %v477_v27 = vmul.f32 %v473_v25, %v467_v22 }
 0x1f1   :  { %v481_v28 = vmul.f32 0.044715, %v477_v27  ;;  %v484_v29 = vadd.f32 %v480_v26, %v464_v17 }
 0x1f3   :  { %v485_v30 = vadd.f32 %v481_v28, %v467_v22  ;;  %v488_v31 = vmul.f32 0.7978846, %v484_v29 }
 0x1f5   :  { %v489_v32 = vmul.f32 0.7978846, %v485_v30  ;;  %1090 = vtanh.f32 %v488_v31 }
 0x1f7   :  { %v1087_v33 = vpop.eup %1086  ;;  %1092 = vtanh.f32 %v489_v32 }
 0x1f8   :  { %v494_v34 = vadd.f32 1.0, %v1087_v33 }
 0x1f9   :  { %v1089_v35 = vpop.eup %1088 }
 0x1fa   :  { %v495_v36 = vadd.f32 1.0, %v1089_v35  ;;  %v498_v37 = vmul.f32 0.5, %v494_v34 }
 0x1fc   :  { %v499_v38 = vmul.f32 0.5, %v495_v36  ;;  %v502_v39 = vmul.f32 %v498_v37, %v456_v0 }
 0x1fe   :  { %v503_v40 = vmul.f32 %v499_v38, %v459_v3  ;;  %506 = vst [vmem:[#allocation2 + $0x1] sm:$0xff] %v502_v39 }
 0x1ff   :  { %v1091_v41 = vpop.eup %1090 }
 0x200   :  { %507 = vst [vmem:[#allocation2 + $0x9] sm:$0xff] %v503_v40  ;;  %v522_v42 = vpack.c.bf16 %v503_v40, %v502_v39  ;;  %v496_v43 = vadd.f32 1.0, %v1091_v41 }
 0x201   :  { %v1093_v44 = vpop.eup %1092 }
 0x202   :  { %755 = vmatprep.mubr.bf16.mxu1 %v522_v42  ;;  %v497_v45 = vadd.f32 1.0, %v1093_v44  ;;  %v500_v46 = vmul.f32 0.5, %v496_v43 }
 0x204   :  { %v501_v47 = vmul.f32 0.5, %v497_v45  ;;  %v504_v48 = vmul.f32 %v500_v46, %v464_v17 }
 0x205   :  { %v510_v49 = vld [vmem:[#allocation2] sm:$0xff] }
 0x206   :  { %v505_v50 = vmul.f32 %v501_v47, %v467_v22  ;;  %508 = vst [vmem:[#allocation2 + $0x19] sm:$0xff] %v504_v48 }
 0x207   :  { %v511_v51 = vld [vmem:[#allocation2 + $0x8] sm:$0xff] }
 0x208   :  { %v516_v52 = vld [vmem:[#allocation2 + $0x2] sm:$0xff]  ;;  %v517_v53 = vld [vmem:[#allocation2 + $0xa] sm:$0xff]  ;;  %v514_v54 = vpack.c.bf16 %v511_v51, %v510_v49  ;;  %509 = vst [vmem:[#allocation2 + $0x21] sm:$0xff] %v505_v50  ;;  %v523_v56 = vpack.c.bf16 %v505_v50, %v504_v48 }
 0x209   :  { %v520_v55 = vpack.c.bf16 %v517_v53, %v516_v52 }
 0x20a   :  { %756 = vmatmul.mubr.bf16.vlgmr.msra.gmra.mrb[8].mxu1 %v514_v54 }
 0x20b   :  { %1020 = vmatprep.mubr.bf16.mxu0 %v520_v55  ;;  %763 = vmatprep.mubr.bf16.mxu1 %v523_v56 }
 0x20d   :  { %v512_v57 = vld [vmem:[#allocation2 + $0x18] sm:$0xff] }
 0x20f   :  { %v513_v58 = vld [vmem:[#allocation2 + $0x20] sm:$0xff] }
 0x210   :  { %v518_v59 = vld [vmem:[#allocation2 + $0x1a] sm:$0xff]  ;;  %v519_v60 = vld [vmem:[#allocation2 + $0x22] sm:$0xff]  ;;  %v515_v61 = vpack.c.bf16 %v513_v58, %v512_v57 }
 0x211   :  { %v521_v62 = vpack.c.bf16 %v519_v60, %v518_v59 }
 0x212   :  { %764 = vmatmul.mubr.bf16.gmra.mrb[12].mxu1 %v515_v61 }
 0x213   :  { %1021 = vmatmul.mubr.bf16.vlgmr.msra.gmra.mrb[8].mxu0 %v521_v62 }
 0x2dd   :  { %v954_v63 = vpop.f32.mrb[8].mxu1 }
 0x2de   :  { %v955_v0 = vpop.f32.mrb[9].mxu1 }
 0x2df   :  { %v956_v1 = vadd.f32 %v955_v0, %v954_v63  ;;  %v957_v2 = vpop.f32.mrb[10].mxu1 }
 0x2e0   :  { %v958_v3 = vpop.f32.mrb[11].mxu1 }
 0x2e1   :  { %v959_v4 = vadd.f32 %v958_v3, %v957_v2  ;;  %v758_v8 = vadd.f32 %v956_v1, %v871_v5 }
 0x2e3   :  { %v761_v15 = vadd.f32 %v959_v4, %v871_v5 }
 0x2e5   :  { %v960_v6 = vpop.f32.mrb[12].mxu1 }
 0x2e6   :  { %v1022_v7 = vpop.f32.mrb[8].mxu0  ;;  %v961_v9 = vpop.f32.mrb[13].mxu1 }
 0x2e7   :  { %v806_v10 = vpop.f32.mrb[9].mxu0  ;;  %v962_v11 = vadd.f32 %v961_v9, %v960_v6  ;;  %v963_v13 = vpop.f32.mrb[14].mxu1 }
 0x2e8   :  { %v807_v12 = vadd.f32 %v806_v10, %v758_v8  ;;  %v1023_v14 = vpop.f32.mrb[10].mxu0  ;;  %v964_v16 = vpop.f32.mrb[15].mxu1 }
 0x2e9   :  { %v809_v17 = vpop.f32.mrb[11].mxu0  ;;  %v766_v18 = vadd.f32 %v962_v11, %v871_v5  ;;  %v965_v19 = vadd.f32 %v964_v16, %v963_v13 }
 0x2ea   :  { %821 = vst.msk [vmem:[#allocation3] sm:$0xff] %vm63_vm0, %v807_v12  ;;  %v810_v20 = vadd.f32 %v809_v17, %v761_v15 }
 0x2eb   :  { %v815_v21 = vadd.f32 %v1022_v7, %v766_v18  ;;  %v769_v22 = vadd.f32 %v965_v19, %v871_v5 }
 0x2ec   :  { %822 = vst.msk [vmem:[#allocation3 + $0x8] sm:$0xff] %vm63_vm0, %v810_v20 }
 0x2ed   :  { %823 = vst.msk [vmem:[#allocation3 + $0x10] sm:$0xff] %vm63_vm0, %v815_v21  ;;  %v818_v23 = vadd.f32 %v1023_v14, %v769_v22 }
 0x2ef   :  { %824 = vst.msk [vmem:[#allocation3 + $0x18] sm:$0xff] %vm63_vm0, %v818_v23 }
 0x2f0   :  { %1105 = shalt.err (!%p1102_p4)
}
 0x2f1   :  { %s1106_s2 = scalar_lea.hbm %s1358_s7, 512 }
 0x2f2   :  { %p1107_p5 = scmp.ne.s32.totalorder %s1358_s7, %s1106_s2  ;;  %p1110_p6 = scmp.lt.u32.totalorder %s1106_s2, %s1358_s7 }
 0x2f4   :  { %p1112_p7 = pnand %p1110_p6, %p1107_p5 }
 0x2f6   :  { %1115 = shalt.err (!%p1112_p7)
}
 0x2f7   :  { %s1120_s15 = smov 128   ;;  %s1121_s16 = smov 8  }
 0x2f8   :  { %836 = dma.vmem_to_hbm [thread:$0]  %s831_s10, 512, %s1358_s7, [#allocation4], %s1120_s15, %s1120_s15, %s1121_s16  }
 0x2f9   :  { %1116 = dma.done.wait [#allocation4], 512  }
 0x2fa   :  { %1117 = vsyncadd [#allocation4], 4294966784 }
 0x2fb   :  { %840 = vsyncpa [#allocation4], 1 }

</bundles_post_ra>
